<compile_context>
chip_gen: v7x
topology: tpu7x:2x2x1
jax: 0.10.0
libtpu: 0.0.40
codegen_flags: <defaults>
</compile_context>

<pallas_src>
import functools

import jax
import jax.numpy as jnp
from jax.experimental import pallas as pl
from jax.experimental.pallas import tpu as pltpu


def _round_up(v, m):
    return (v + m - 1) // m * m


def _pack_offsets(in_dim, hidden):
    """Row offsets of each parameter block inside the packed (rows, hidden) buffer."""
    o_wih = 0                                  # w_ih.T            (in_dim, hidden)
    o_whh = o_wih + in_dim                     # w_hh.T            (hidden, hidden)
    o_b = o_whh + hidden                       # b_ih + b_hh       (1, hidden)
    o_fc = _round_up(o_b + 1, 8)               # w_fc.T, lane-padded (hidden, hidden)
    o_bfc = o_fc + hidden                      # b_fc, lane-padded (1, hidden)
    rows = _round_up(o_bfc + 1, 8)
    return o_wih, o_whh, o_b, o_fc, o_bfc, rows


def prepare_params(w_ih, w_hh, b_ih, b_hh, w_fc, b_fc):
    """One-time parameter packing (setup time, NOT on the per-call path).

    Packs all RNN + FC weights/biases into a single (rows, H) f32 buffer so the
    kernel takes exactly two operands (x, params): fewer tiny DMAs, and the
    transposes / bias pre-sum are hoisted out of the forward call entirely.

    PyTorch layouts in: w_ih [H, D], w_hh [H, H], b_ih/b_hh [H], w_fc [C, H], b_fc [C].
    """
    hidden, in_dim = w_ih.shape
    classes = w_fc.shape[0]
    assert in_dim % 8 == 0 and hidden % 8 == 0, "in_dim/hidden must be multiples of 8"
    assert classes <= hidden, "num_classes must fit in the hidden lane width"
    o_wih, o_whh, o_b, o_fc, o_bfc, rows = _pack_offsets(in_dim, hidden)

    p = jnp.zeros((rows, hidden), jnp.float32)
    p = p.at[o_wih:o_wih + in_dim, :].set(jnp.transpose(w_ih).astype(jnp.float32))
    p = p.at[o_whh:o_whh + hidden, :].set(jnp.transpose(w_hh).astype(jnp.float32))
    p = p.at[o_b, :].set((b_ih + b_hh).astype(jnp.float32))
    # FC weight stored as w_fc.T zero-padded to full lane width (lanes >= C are 0),
    # so the final projection stays a standard lane-dense (H, H) MXU matmul.
    p = p.at[o_fc:o_fc + hidden, :classes].set(jnp.transpose(w_fc).astype(jnp.float32))
    p = p.at[o_bfc, :classes].set(b_fc.astype(jnp.float32))
    return p


def rnn_kernel(x_ref, p_ref, out_ref, *, batch, seq_len, row_block):
    B, T, RB = batch, seq_len, row_block
    D = x_ref.shape[1]
    H = p_ref.shape[1]
    C = out_ref.shape[1]
    o_wih, o_whh, o_b, o_fc, o_bfc, _ = _pack_offsets(D, H)

    # Static, 8-aligned views into the single packed parameter buffer.
    wih_t = p_ref[o_wih:o_wih + D, :]            # (D, H)
    whh_t = p_ref[o_whh:o_whh + H, :]            # (H, H)
    bias = p_ref[o_b:o_b + 1, :]                 # (1, H)   pre-summed b_ih + b_hh
    wfc_t = p_ref[o_fc:o_fc + H, :]              # (H, H)   w_fc.T, lanes >= C are zero
    bfc = p_ref[o_bfc:o_bfc + 1, :]              # (1, H)   b_fc,  lanes >= C are zero

    # Input projection for ALL timesteps in one MXU matmul (f32, off the
    # critical path), with the RNN bias folded in.  xw rows [t*RB, t*RB+B) are
    # real; padding rows stay bounded and never mix into real rows (the
    # recurrence is row-independent), so they are harmless.
    xw = jnp.dot(x_ref[...], wih_t, preferred_element_type=jnp.float32) + bias  # (T*RB, H)

    # Loop-invariant recurrent weight cast to bf16 once -> single MXU pass per
    # step. Accumulation is f32; tanh stays f32 (v5e-friendly).
    whh_bf = whh_t.astype(jnp.bfloat16)

    # t = 0: h0 == 0, so no recurrent matmul at all.
    h = jnp.tanh(xw[0:RB, :])                    # (RB, H) f32

    # Serial recurrence, fully unrolled (T small & static). Per-step critical
    # chain: bf16 cast -> one MXU matmul -> VPU add -> EUP tanh. Slices are
    # RB(=8)-aligned so they lower to free static views.
    for t in range(1, T):
        rec = jnp.dot(h.astype(jnp.bfloat16), whh_bf,
                      preferred_element_type=jnp.float32)
        h = jnp.tanh(xw[t * RB:(t + 1) * RB, :] + rec)

    # Final FC (lane-dense padded weight -> standard matmul form) + softmax(dim=1)
    # on the real batch rows / real class lanes only.
    logits_full = jnp.dot(h, wfc_t, preferred_element_type=jnp.float32) + bfc  # (RB, H)
    logits = logits_full[0:B, 0:C]                                             # (B, C)
    m = jnp.max(logits, axis=1, keepdims=True)
    e = jnp.exp(logits - m)
    out_ref[...] = (e / jnp.sum(e, axis=1, keepdims=True)).astype(out_ref.dtype)


@functools.partial(jax.jit, static_argnames=("num_classes",))
def rnn_forward(x_btd, packed_params, *, num_classes):
    """x_btd: [B, T, D] float32 (batch_first, like PyTorch nn.RNN).

    packed_params: output of prepare_params (built once at setup time).
    Returns softmax(fc(h_T)) with shape [B, num_classes].
    """
    B, T, D = x_btd.shape
    H = packed_params.shape[1]
    C = num_classes
    RB = _round_up(max(B, 1), 8)                 # sublane-aligned rows per timestep

    # Time-major, sublane-padded layout: rows [t*RB, t*RB+B) hold timestep t.
    # (Tiny layout-only ops; fused with the pallas_call under jit.)
    x_tbd = jnp.swapaxes(x_btd, 0, 1)                                  # (T, B, D)
    x_flat = jnp.pad(x_tbd, ((0, 0), (0, RB - B), (0, 0))).reshape(T * RB, D)

    kernel = functools.partial(rnn_kernel, batch=B, seq_len=T, row_block=RB)
    vmem = pl.BlockSpec(memory_space=pltpu.MemorySpace.VMEM)
    return pl.pallas_call(
        kernel,
        out_shape=jax.ShapeDtypeStruct((B, C), jnp.float32),
        in_specs=[vmem, vmem],                   # whole arrays as single VMEM blocks
        out_specs=vmem,
    )(x_flat, packed_params)


def rnn_reference(x_btd, w_ih, w_hh, b_ih, b_hh, w_fc, b_fc):
    B, T, D = x_btd.shape
    H = w_ih.shape[0]
    h = jnp.zeros((B, H), jnp.float32)
    for t in range(T):
        h = jnp.tanh(x_btd[:, t, :] @ w_ih.T + b_ih + h @ w_hh.T + b_hh)
    logits = h @ w_fc.T + b_fc
    return jax.nn.softmax(logits, axis=1)


if __name__ == "__main__":
    B, T = 2, 8
    D = 64          # last_dim_size
    H = 64          # hidden_dim
    C = 2           # num_classes

    key = jax.random.PRNGKey(0)
    kx, k1, k2, k3, k4, k5, k6 = jax.random.split(key, 7)

    x = jax.random.normal(kx, (B, T, D), dtype=jnp.float32)

    # PyTorch-style uniform(-1/sqrt(H), 1/sqrt(H)) init (deterministic).
    bound = 1.0 / jnp.sqrt(jnp.float32(H))
    w_ih = jax.random.uniform(k1, (H, D), jnp.float32, -bound, bound)
    w_hh = jax.random.uniform(k2, (H, H), jnp.float32, -bound, bound)
    b_ih = jax.random.uniform(k3, (H,), jnp.float32, -bound, bound)
    b_hh = jax.random.uniform(k4, (H,), jnp.float32, -bound, bound)
    w_fc = jax.random.uniform(k5, (C, H), jnp.float32, -bound, bound)
    b_fc = jax.random.uniform(k6, (C,), jnp.float32, -bound, bound)

    # One-time parameter packing (setup time).
    params = prepare_params(w_ih, w_hh, b_ih, b_hh, w_fc, b_fc)

    out = rnn_forward(x, params, num_classes=C)
    out = jax.block_until_ready(out)

    ref = rnn_reference(x, w_ih, w_hh, b_ih, b_hh, w_fc, b_fc)
    assert out.shape == (B, C)
    # Tolerance relaxed (vs 1e-5) because the recurrent matmul uses bf16
    # operands with f32 accumulation, as recommended by the perf review.
    assert jnp.allclose(out, ref, atol=2e-2, rtol=0.0), (out, ref)
    assert jnp.allclose(jnp.sum(out, axis=1), 1.0, atol=1e-5)

    print("KERNEL_OK")
</pallas_src>

<mosaic_0001>
module attributes {stable_mosaic.version = 11 : i64} {
  func.func @rnn_kernel(%arg0: memref<64x64xf32, #tpu.memory_space<vmem>>, %arg1: memref<208x64xf32, #tpu.memory_space<vmem>>, %arg2: memref<2x2xf32, #tpu.memory_space<vmem>>) attributes {dimension_semantics = [], scalar_prefetch = 0 : i64, scratch_operands = 0 : i64, tpu.core_type = #tpu.core_type<tc>} {
    %c0 = arith.constant 0 : index
    %c0_0 = arith.constant 0 : index
    %0 = vector.load %arg1[%c0, %c0_0] : memref<208x64xf32, #tpu.memory_space<vmem>>, vector<64x64xf32>
    %c64 = arith.constant 64 : index
    %c0_1 = arith.constant 0 : index
    %1 = vector.load %arg1[%c64, %c0_1] : memref<208x64xf32, #tpu.memory_space<vmem>>, vector<64x64xf32>
    %c128 = arith.constant 128 : index
    %c0_2 = arith.constant 0 : index
    %2 = vector.load %arg1[%c128, %c0_2] : memref<208x64xf32, #tpu.memory_space<vmem>>, vector<1x64xf32>
    %c136 = arith.constant 136 : index
    %c0_3 = arith.constant 0 : index
    %3 = vector.load %arg1[%c136, %c0_3] : memref<208x64xf32, #tpu.memory_space<vmem>>, vector<64x64xf32>
    %c200 = arith.constant 200 : index
    %c0_4 = arith.constant 0 : index
    %4 = vector.load %arg1[%c200, %c0_4] : memref<208x64xf32, #tpu.memory_space<vmem>>, vector<1x64xf32>
    %c0_5 = arith.constant 0 : index
    %c0_6 = arith.constant 0 : index
    %5 = vector.load %arg0[%c0_5, %c0_6] : memref<64x64xf32, #tpu.memory_space<vmem>>, vector<64x64xf32>
    %cst = arith.constant dense<0.000000e+00> : vector<64x64xf32>
    %6 = tpu.matmul %5, %0, %cst {dimension_numbers = #tpu.dot_dimension_numbers<[1], [0], [0], [1], [0, 0, 1, 1], [], []>} : vector<64x64xf32>, vector<64x64xf32>, vector<64x64xf32> -> vector<64x64xf32>
    %7 = vector.broadcast %2 : vector<1x64xf32> to vector<64x64xf32>
    %8 = arith.addf %6, %7 : vector<64x64xf32>
    %9 = arith.truncf %1 : vector<64x64xf32> to vector<64x64xbf16>
    %10 = vector.extract_strided_slice %8 {offsets = [0, 0], sizes = [8, 64], strides = [1, 1]} : vector<64x64xf32> to vector<8x64xf32>
    %11 = math.tanh %10 : vector<8x64xf32>
    %12 = arith.truncf %11 : vector<8x64xf32> to vector<8x64xbf16>
    %cst_7 = arith.constant dense<0.000000e+00> : vector<8x64xf32>
    %13 = tpu.matmul %12, %9, %cst_7 {dimension_numbers = #tpu.dot_dimension_numbers<[1], [0], [0], [1], [0, 0, 1, 1], [], []>} : vector<8x64xbf16>, vector<64x64xbf16>, vector<8x64xf32> -> vector<8x64xf32>
    %14 = vector.extract_strided_slice %8 {offsets = [8, 0], sizes = [8, 64], strides = [1, 1]} : vector<64x64xf32> to vector<8x64xf32>
    %15 = arith.addf %14, %13 : vector<8x64xf32>
    %16 = math.tanh %15 : vector<8x64xf32>
    %17 = arith.truncf %16 : vector<8x64xf32> to vector<8x64xbf16>
    %cst_8 = arith.constant dense<0.000000e+00> : vector<8x64xf32>
    %18 = tpu.matmul %17, %9, %cst_8 {dimension_numbers = #tpu.dot_dimension_numbers<[1], [0], [0], [1], [0, 0, 1, 1], [], []>} : vector<8x64xbf16>, vector<64x64xbf16>, vector<8x64xf32> -> vector<8x64xf32>
    %19 = vector.extract_strided_slice %8 {offsets = [16, 0], sizes = [8, 64], strides = [1, 1]} : vector<64x64xf32> to vector<8x64xf32>
    %20 = arith.addf %19, %18 : vector<8x64xf32>
    %21 = math.tanh %20 : vector<8x64xf32>
    %22 = arith.truncf %21 : vector<8x64xf32> to vector<8x64xbf16>
    %cst_9 = arith.constant dense<0.000000e+00> : vector<8x64xf32>
    %23 = tpu.matmul %22, %9, %cst_9 {dimension_numbers = #tpu.dot_dimension_numbers<[1], [0], [0], [1], [0, 0, 1, 1], [], []>} : vector<8x64xbf16>, vector<64x64xbf16>, vector<8x64xf32> -> vector<8x64xf32>
    %24 = vector.extract_strided_slice %8 {offsets = [24, 0], sizes = [8, 64], strides = [1, 1]} : vector<64x64xf32> to vector<8x64xf32>
    %25 = arith.addf %24, %23 : vector<8x64xf32>
    %26 = math.tanh %25 : vector<8x64xf32>
    %27 = arith.truncf %26 : vector<8x64xf32> to vector<8x64xbf16>
    %cst_10 = arith.constant dense<0.000000e+00> : vector<8x64xf32>
    %28 = tpu.matmul %27, %9, %cst_10 {dimension_numbers = #tpu.dot_dimension_numbers<[1], [0], [0], [1], [0, 0, 1, 1], [], []>} : vector<8x64xbf16>, vector<64x64xbf16>, vector<8x64xf32> -> vector<8x64xf32>
    %29 = vector.extract_strided_slice %8 {offsets = [32, 0], sizes = [8, 64], strides = [1, 1]} : vector<64x64xf32> to vector<8x64xf32>
    %30 = arith.addf %29, %28 : vector<8x64xf32>
    %31 = math.tanh %30 : vector<8x64xf32>
    %32 = arith.truncf %31 : vector<8x64xf32> to vector<8x64xbf16>
    %cst_11 = arith.constant dense<0.000000e+00> : vector<8x64xf32>
    %33 = tpu.matmul %32, %9, %cst_11 {dimension_numbers = #tpu.dot_dimension_numbers<[1], [0], [0], [1], [0, 0, 1, 1], [], []>} : vector<8x64xbf16>, vector<64x64xbf16>, vector<8x64xf32> -> vector<8x64xf32>
    %34 = vector.extract_strided_slice %8 {offsets = [40, 0], sizes = [8, 64], strides = [1, 1]} : vector<64x64xf32> to vector<8x64xf32>
    %35 = arith.addf %34, %33 : vector<8x64xf32>
    %36 = math.tanh %35 : vector<8x64xf32>
    %37 = arith.truncf %36 : vector<8x64xf32> to vector<8x64xbf16>
    %cst_12 = arith.constant dense<0.000000e+00> : vector<8x64xf32>
    %38 = tpu.matmul %37, %9, %cst_12 {dimension_numbers = #tpu.dot_dimension_numbers<[1], [0], [0], [1], [0, 0, 1, 1], [], []>} : vector<8x64xbf16>, vector<64x64xbf16>, vector<8x64xf32> -> vector<8x64xf32>
    %39 = vector.extract_strided_slice %8 {offsets = [48, 0], sizes = [8, 64], strides = [1, 1]} : vector<64x64xf32> to vector<8x64xf32>
    %40 = arith.addf %39, %38 : vector<8x64xf32>
    %41 = math.tanh %40 : vector<8x64xf32>
    %42 = arith.truncf %41 : vector<8x64xf32> to vector<8x64xbf16>
    %cst_13 = arith.constant dense<0.000000e+00> : vector<8x64xf32>
    %43 = tpu.matmul %42, %9, %cst_13 {dimension_numbers = #tpu.dot_dimension_numbers<[1], [0], [0], [1], [0, 0, 1, 1], [], []>} : vector<8x64xbf16>, vector<64x64xbf16>, vector<8x64xf32> -> vector<8x64xf32>
    %44 = vector.extract_strided_slice %8 {offsets = [56, 0], sizes = [8, 64], strides = [1, 1]} : vector<64x64xf32> to vector<8x64xf32>
    %45 = arith.addf %44, %43 : vector<8x64xf32>
    %46 = math.tanh %45 : vector<8x64xf32>
    %cst_14 = arith.constant dense<0.000000e+00> : vector<8x64xf32>
    %47 = tpu.matmul %46, %3, %cst_14 {dimension_numbers = #tpu.dot_dimension_numbers<[1], [0], [0], [1], [0, 0, 1, 1], [], []>} : vector<8x64xf32>, vector<64x64xf32>, vector<8x64xf32> -> vector<8x64xf32>
    %48 = vector.broadcast %4 : vector<1x64xf32> to vector<8x64xf32>
    %49 = arith.addf %47, %48 : vector<8x64xf32>
    %50 = vector.extract_strided_slice %49 {offsets = [0, 0], sizes = [2, 2], strides = [1, 1]} : vector<8x64xf32> to vector<2x2xf32>
    %cst_15 = arith.constant dense<0xFF800000> : vector<2xf32>
    %51 = vector.multi_reduction <maximumf>, %50, %cst_15 [1] : vector<2x2xf32> to vector<2xf32>
    %52 = vector.shape_cast %51 : vector<2xf32> to vector<2x1xf32>
    %53 = vector.broadcast %52 : vector<2x1xf32> to vector<2x2xf32>
    %54 = arith.subf %50, %53 : vector<2x2xf32>
    %55 = math.exp %54 : vector<2x2xf32>
    %cst_16 = arith.constant dense<0.000000e+00> : vector<2xf32>
    %56 = vector.multi_reduction <add>, %55, %cst_16 [1] : vector<2x2xf32> to vector<2xf32>
    %57 = vector.shape_cast %56 : vector<2xf32> to vector<2x1xf32>
    %58 = vector.broadcast %57 : vector<2x1xf32> to vector<2x2xf32>
    %59 = arith.divf %55, %58 : vector<2x2xf32>
    %c0_17 = arith.constant 0 : index
    %c0_18 = arith.constant 0 : index
    %60 = vector.load %arg2[%c0_17, %c0_18] : memref<2x2xf32, #tpu.memory_space<vmem>>, vector<2x2xf32>
    tpu.vector_store %arg2[%c0_17, %c0_18], %59 {strides = array<i32>} : memref<2x2xf32, #tpu.memory_space<vmem>>, vector<2x2xf32>,
    return
  }
}

</mosaic_0001>

<bundles_post_ra>
// kernel: rnn_forward.1
= control target key start
LH: loop header
LB: loop body
LE: loop exit
PB: predicated region body
PF: predicated region fallthrough
CT: control target
= control target key end

     0   :  { %vm51_vm0 = vcmask 523264   ;;  %s1145_s0 = inlined_call_operand.vmem [shape: f32[64,64], index: 0, kind: input, shape index: {}]   ;;  %s1146_s1 = inlined_call_operand.vmem [shape: f32[208,64], index: 1, kind: input, shape index: {}]   ;;  %s1147_s2 = inlined_call_operand.hbm [shape: f32[2,2], index: 2, kind: output, shape index: {}]  }
   0x1   :  { %v13_v0 = vld [vmem:[%s1146_s1] sm:$0xff]  ;;  %v14_v1 = vld [vmem:[%s1146_s1 + $0x8] sm:$0xff]  ;;  %v15_v2 = vld [vmem:[%s1146_s1 + $0x10] sm:$0xff] }
   0x2   :  { %v821_v3 = vpack.c.bf16 %v14_v1, %v13_v0  ;;  %v16_v4 = vld [vmem:[%s1146_s1 + $0x18] sm:$0xff]  ;;  %v17_v6 = vld [vmem:[%s1146_s1 + $0x20] sm:$0xff]  ;;  %v18_v7 = vld [vmem:[%s1146_s1 + $0x28] sm:$0xff] }
   0x3   :  { %v825_v5 = vpack.c.bf16 %v16_v4, %v15_v2  ;;  %v39_v8 = vld [vmem:[%s1145_s0] sm:$0xff] }
   0x4   :  { %822 = vmatprep.subr.bf16.mxu0 %v821_v3  ;;  %706 = vmatprep.mubr.msk.f32.mxu0 %vm51_vm0, %v39_v8 }
   0x5   :  { %7 = vsyncpa [#allocation3], 0  ;;  %824 = vmatpush3.bf16.msra.mxu0 %v821_v3  ;;  %v829_v9 = vpack.c.bf16 %v18_v7, %v17_v6  ;;  %v19_v10 = vld [vmem:[%s1146_s1 + $0x30] sm:$0xff]  ;;  %v20_v11 = vld [vmem:[%s1146_s1 + $0x38] sm:$0xff]  ;;  %v897_v17 = vmov 0.0   ;;  %vm898_vm1 = vmmov 0  }
   0x6   :  { %826 = vmatprep.subr.bf16.mxu0 %v825_v5  ;;  %v833_v12 = vpack.c.bf16 %v20_v11, %v19_v10  ;;  %v40_v13 = vld [vmem:[%s1145_s0 + $0x8] sm:$0xff]  ;;  %v21_v14 = vld [vmem:[%s1146_s1 + $0x40] sm:$0xff]  ;;  %718 = vmatprep.subr.bf16.mxu1 %v897_v17  ;;  %v23_v18 = vld [vmem:[%s1146_s1 + $0x50] sm:$0xff]  ;;  %vm585_vm2 = vcmask 9216   ;;  %s900_s20 = smov [#allocation2]  }
   0x7   :  { %v22_v15 = vld [vmem:[%s1146_s1 + $0x48] sm:$0xff]  ;;  %v24_v19 = vld [vmem:[%s1146_s1 + $0x58] sm:$0xff]  ;;  %v25_v21 = vld [vmem:[%s1146_s1 + $0x60] sm:$0xff]  ;;  %726 = vmatprep.mubr.msk.bf16.mxu1 %vm898_vm1, %v897_v17  ;;  %s604_s21 = sshll.u32 %s900_s20, 4  ;;  %s605_s21 = int_to_ptr.vmem [resolvable:$true] %s604_s21 }
   0x8   :  { %v954_v16 = vpack.c.bf16 %v22_v15, %v21_v14  ;;  %v968_v20 = vpack.c.bf16 %v24_v19, %v23_v18  ;;  %v26_v22 = vld [vmem:[%s1146_s1 + $0x68] sm:$0xff]  ;;  %v27_v24 = vld [vmem:[%s1146_s1 + $0x70] sm:$0xff]  ;;  %v28_v25 = vld [vmem:[%s1146_s1 + $0x78] sm:$0xff]  ;;  %p878_p1 = scmp.lt.s32.totalorder %s605_s21, %s605_s21 }
   0x9   :  { %828 = vmatpush3.bf16.msra.mxu0 %v825_v5  ;;  %v980_v23 = vpack.c.bf16 %v26_v22, %v25_v21  ;;  %v992_v26 = vpack.c.bf16 %v28_v25, %v27_v24  ;;  %v1003_v27 = vld [vmem:[%s1146_s1 + $0x80] ss:$0 sm:$0xff]  ;;  %v41_v33 = vld [vmem:[%s1145_s0 + $0x10] sm:$0xff]  ;;  %v42_v34 = vld [vmem:[%s1145_s0 + $0x18] sm:$0xff]  ;;  %v899_v24 = vmov 0.0|0.0  }
   0xa   :  { %830 = vmatprep.subr.bf16.mxu0 %v829_v9  ;;  %719 = vmatpush3.bf16.msra.mxu1 %v954_v16  ;;  %v43_v35 = vld [vmem:[%s1145_s0 + $0x20] sm:$0xff]  ;;  %v44_v36 = vld [vmem:[%s1145_s0 + $0x28] sm:$0xff]  ;;  %v45_v37 = vld [vmem:[%s1145_s0 + $0x30] sm:$0xff] }
   0xb   :  { %720 = vmatprep.subr.bf16.mxu1 %v897_v17  ;;  %v46_v38 = vld [vmem:[%s1145_s0 + $0x38] sm:$0xff] }
   0xd   :  { %832 = vmatpush3.bf16.msra.mxu0 %v829_v9 }
   0xe   :  { %834 = vmatprep.subr.bf16.mxu0 %v833_v12  ;;  %721 = vmatpush3.bf16.msra.mxu1 %v968_v20 }
   0xf   :  { %722 = vmatprep.subr.bf16.mxu1 %v897_v17 }
  0x11   :  { %836 = vmatpush3.bf16.msra.mxu0 %v833_v12 }
  0x12   :  { %730 = vmatprep.subr.bf16.mxu0 %v897_v17  ;;  %723 = vmatpush3.bf16.msra.mxu1 %v980_v23 }
  0x13   :  { %724 = vmatprep.subr.bf16.mxu1 %v897_v17 }
  0x14   :  { %707 = vmatmul.mubr.msk.f32.vlgmr.msra.gmra.mrb[0].mxu0 %vm51_vm0, %v40_v13 }
  0x15   :  { %731 = vmatpush3.bf16.msra.mxu0 %v954_v16  ;;  %709 = vmatprep.mubr.msk.f32.mxu0 %vm51_vm0, %v41_v33 }
  0x16   :  { %732 = vmatprep.subr.bf16.mxu0 %v897_v17  ;;  %725 = vmatpush3.bf16.msra.mxu1 %v992_v26 }
  0x17   :  { %742 = vmatprep.subr.bf16.mxu1 %v897_v17 }
  0x18   :  { %710 = vmatmul.mubr.msk.f32.gmra.mrb[2].mxu0 %vm51_vm0, %v42_v34  ;;  %v32_v34 = vld [vmem:[%s1146_s1 + $0x98] sm:$0xff] }
  0x19   :  { %733 = vmatpush3.bf16.msra.mxu0 %v968_v20  ;;  %712 = vmatprep.mubr.msk.f32.mxu0 %vm51_vm0, %v43_v35  ;;  %v33_v35 = vld [vmem:[%s1146_s1 + $0xa0] sm:$0xff] }
  0x1a   :  { %734 = vmatprep.subr.bf16.mxu0 %v897_v17 }
  0x1c   :  { %713 = vmatmul.mubr.msk.f32.gmra.mrb[4].mxu0 %vm51_vm0, %v44_v36  ;;  %v841_v36 = vpack.c.bf16 %v33_v35, %v32_v34 }
  0x1d   :  { %735 = vmatpush3.bf16.msra.mxu0 %v980_v23  ;;  %715 = vmatprep.mubr.msk.f32.mxu0 %vm51_vm0, %v45_v37  ;;  %v34_v37 = vld [vmem:[%s1146_s1 + $0xa8] sm:$0xff] }
  0x1e   :  { %736 = vmatprep.subr.bf16.mxu0 %v897_v17 }
  0x20   :  { %716 = vmatmul.mubr.msk.f32.gmra.mrb[6].mxu0 %vm51_vm0, %v46_v38  ;;  %v35_v38 = vld [vmem:[%s1146_s1 + $0xb0] sm:$0xff] }
  0x21   :  { %737 = vmatpush3.bf16.msra.mxu0 %v992_v26  ;;  %738 = vmatprep.mubr.msk.bf16.mxu0 %vm898_vm1, %v897_v17 }
  0x22   :  { %754 = vmatprep.subr.bf16.mxu0 %v897_v17 }
  0xe7   :  { %v708_v28 = vpop.f32.mrb[0].mxu0 }
  0xe8   :  { %v142_v29 = vpop.f32.mrb[1].mxu0  ;;  %v148_v39 = vadd.f32 %v708_v28, %v1003_v27 }
  0xe9   :  { %v143_v30 = vadd.f32 %v1003_v27, %v142_v29 }
  0xeb   :  { %853 = vtanh.f32 %v143_v30  ;;  %v711_v47 = vpop.f32.mrb[2].mxu0 }
  0xec   :  { %v152_v48 = vpop.f32.mrb[3].mxu0  ;;  %v158_v61 = vadd.f32 %v711_v47, %v1003_v27 }
  0xed   :  { %v153_v53 = vadd.f32 %v1003_v27, %v152_v48 }
  0xef   :  { %v714_v49 = vpop.f32.mrb[4].mxu0 }
  0xf0   :  { %v162_v50 = vpop.f32.mrb[5].mxu0  ;;  %v168_v13 = vadd.f32 %v714_v49, %v1003_v27 }
  0xf1   :  { %v163_v5 = vadd.f32 %v1003_v27, %v162_v50  ;;  %v628_v50 = vld [vmem:[%s1146_s1 + $0xc8] ss:$0 sm:$0xff] }
  0xf3   :  { %v1055_v51 = vpop.f32.mrb[6].mxu0 }
  0xf4   :  { %v1057_v52 = vpop.f32.mrb[7].mxu0 }
  0xf5   :  { %v854_v31 = vpop.eup %853 }
  0xf6   :  { %v186_v32 = vpack.c.bf16 %v854_v31, %v854_v31 }
  0xf8   :  { %727 = vmatmul.mubr.msk.bf16.vlgmr.msra.gmra.mrb[0].mxu1 %vm51_vm0, %v186_v32 }
  0xf9   :  { %743 = vmatpush3.bf16.msra.mxu1 %v954_v16  ;;  %750 = vmatprep.mubr.msk.bf16.mxu1 %vm898_vm1, %v897_v17 }
  0xfa   :  { %744 = vmatprep.subr.bf16.mxu1 %v897_v17 }
  0xfd   :  { %745 = vmatpush3.bf16.msra.mxu1 %v968_v20 }
  0xfe   :  { %746 = vmatprep.subr.bf16.mxu1 %v897_v17 }
 0x101   :  { %747 = vmatpush3.bf16.msra.mxu1 %v980_v23 }
 0x102   :  { %748 = vmatprep.subr.bf16.mxu1 %v897_v17 }
 0x105   :  { %749 = vmatpush3.bf16.msra.mxu1 %v992_v26 }
 0x106   :  { %766 = vmatprep.subr.bf16.mxu1 %v897_v17 }
 0x1cb   :  { %v224_v40 = vpop.f32.mrb[0].mxu1 }
 0x1cc   :  { %v230_v41 = vadd.f32 %v224_v40, %v148_v39  ;;  %v728_v42 = vpop.f32.mrb[1].mxu1  ;;  %v844_v39 = vpack.c.bf16 %v35_v38, %v34_v37  ;;  %v36_v40 = vld [vmem:[%s1146_s1 + $0xb8] sm:$0xff] }
 0x1cd   :  { %v227_v43 = vpop.f32.mrb[2].mxu1 }
 0x1ce   :  { %855 = vtanh.f32 %v230_v41  ;;  %v729_v44 = vpop.f32.mrb[3].mxu1  ;;  %v37_v41 = vld [vmem:[%s1146_s1 + $0xc0] sm:$0xff]  ;;  %v178_v43 = vadd.f32 %v1055_v51, %v1003_v27 }
 0x1cf   :  { %v847_v42 = vpack.c.bf16 %v37_v41, %v36_v40 }
 0x1d8   :  { %v856_v45 = vpop.eup %855 }
 0x1d9   :  { %v232_v46 = vpack.c.bf16 %v856_v45, %v856_v45 }
 0x1db   :  { %739 = vmatmul.mubr.msk.bf16.vlgmr.msra.gmra.mrb[8].mxu0 %vm51_vm0, %v232_v46 }
 0x1dc   :  { %755 = vmatpush3.bf16.msra.mxu0 %v954_v16  ;;  %762 = vmatprep.mubr.msk.bf16.mxu0 %vm898_vm1, %v897_v17 }
 0x1dd   :  { %756 = vmatprep.subr.bf16.mxu0 %v897_v17 }
 0x1e0   :  { %757 = vmatpush3.bf16.msra.mxu0 %v968_v20 }
 0x1e1   :  { %758 = vmatprep.subr.bf16.mxu0 %v897_v17 }
 0x1e4   :  { %759 = vmatpush3.bf16.msra.mxu0 %v980_v23 }
 0x1e5   :  { %760 = vmatprep.subr.bf16.mxu0 %v897_v17 }
 0x1e8   :  { %761 = vmatpush3.bf16.msra.mxu0 %v992_v26 }
 0x1e9   :  { %778 = vmatprep.subr.bf16.mxu0 %v897_v17 }
 0x2ae   :  { %v270_v54 = vpop.f32.mrb[8].mxu0 }
 0x2af   :  { %v276_v55 = vadd.f32 %v270_v54, %v153_v53  ;;  %v740_v56 = vpop.f32.mrb[9].mxu0 }
 0x2b0   :  { %v273_v57 = vpop.f32.mrb[10].mxu0 }
 0x2b1   :  { %857 = vtanh.f32 %v276_v55  ;;  %v741_v58 = vpop.f32.mrb[11].mxu0 }
 0x2bb   :  { %v858_v59 = vpop.eup %857 }
 0x2bc   :  { %v278_v60 = vpack.c.bf16 %v858_v59, %v858_v59 }
 0x2be   :  { %751 = vmatmul.mubr.msk.bf16.vlgmr.msra.gmra.mrb[4].mxu1 %vm51_vm0, %v278_v60 }
 0x2bf   :  { %767 = vmatpush3.bf16.msra.mxu1 %v954_v16  ;;  %774 = vmatprep.mubr.msk.bf16.mxu1 %vm898_vm1, %v897_v17 }
 0x2c0   :  { %768 = vmatprep.subr.bf16.mxu1 %v897_v17 }
 0x2c3   :  { %769 = vmatpush3.bf16.msra.mxu1 %v968_v20 }
 0x2c4   :  { %770 = vmatprep.subr.bf16.mxu1 %v897_v17 }
 0x2c7   :  { %771 = vmatpush3.bf16.msra.mxu1 %v980_v23 }
 0x2c8   :  { %772 = vmatprep.subr.bf16.mxu1 %v897_v17 }
 0x2cb   :  { %773 = vmatpush3.bf16.msra.mxu1 %v992_v26 }
 0x2cc   :  { %790 = vmatprep.subr.bf16.mxu1 %v897_v17 }
 0x391   :  { %v316_v62 = vpop.f32.mrb[4].mxu1 }
 0x392   :  { %v322_v63 = vadd.f32 %v316_v62, %v158_v61  ;;  %v752_v0 = vpop.f32.mrb[5].mxu1 }
 0x393   :  { %v319_v1 = vpop.f32.mrb[6].mxu1 }
 0x394   :  { %859 = vtanh.f32 %v322_v63  ;;  %v753_v2 = vpop.f32.mrb[7].mxu1 }
 0x39e   :  { %v860_v3 = vpop.eup %859 }
 0x39f   :  { %v324_v4 = vpack.c.bf16 %v860_v3, %v860_v3 }
 0x3a1   :  { %763 = vmatmul.mubr.msk.bf16.vlgmr.msra.gmra.mrb[12].mxu0 %vm51_vm0, %v324_v4 }
 0x3a2   :  { %779 = vmatpush3.bf16.msra.mxu0 %v954_v16  ;;  %786 = vmatprep.mubr.msk.bf16.mxu0 %vm898_vm1, %v897_v17 }
 0x3a3   :  { %780 = vmatprep.subr.bf16.mxu0 %v897_v17 }
 0x3a6   :  { %781 = vmatpush3.bf16.msra.mxu0 %v968_v20 }
 0x3a7   :  { %782 = vmatprep.subr.bf16.mxu0 %v897_v17 }
 0x3aa   :  { %783 = vmatpush3.bf16.msra.mxu0 %v980_v23 }
 0x3ab   :  { %784 = vmatprep.subr.bf16.mxu0 %v897_v17 }
 0x3ae   :  { %785 = vmatpush3.bf16.msra.mxu0 %v992_v26 }
 0x3af   :  { %837 = vmatprep.subr.bf16.mxu0 %v899_v24 }
 0x474   :  { %v362_v6 = vpop.f32.mrb[12].mxu0 }
 0x475   :  { %v368_v7 = vadd.f32 %v362_v6, %v163_v5  ;;  %v764_v8 = vpop.f32.mrb[13].mxu0 }
 0x476   :  { %v365_v9 = vpop.f32.mrb[14].mxu0 }
 0x477   :  { %861 = vtanh.f32 %v368_v7  ;;  %v765_v10 = vpop.f32.mrb[15].mxu0 }
 0x481   :  { %v862_v11 = vpop.eup %861 }
 0x482   :  { %v370_v12 = vpack.c.bf16 %v862_v11, %v862_v11 }
 0x484   :  { %775 = vmatmul.mubr.msk.bf16.vlgmr.msra.gmra.mrb[8].mxu1 %vm51_vm0, %v370_v12 }
 0x485   :  { %791 = vmatpush3.bf16.msra.mxu1 %v954_v16  ;;  %798 = vmatprep.mubr.msk.bf16.mxu1 %vm898_vm1, %v897_v17 }
 0x486   :  { %792 = vmatprep.subr.bf16.mxu1 %v897_v17 }
 0x489   :  { %793 = vmatpush3.bf16.msra.mxu1 %v968_v20  ;;  %v30_v20 = vld [vmem:[%s1146_s1 + $0x88] sm:$0xff] }
 0x48a   :  { %794 = vmatprep.subr.bf16.mxu1 %v897_v17 }
 0x48d   :  { %795 = vmatpush3.bf16.msra.mxu1 %v980_v23  ;;  %v31_v23 = vld [vmem:[%s1146_s1 + $0x90] sm:$0xff]  ;;  %s873_s1 = scalar_lea.vmem %s605_s21, 32 }
 0x48e   :  { %796 = vmatprep.subr.bf16.mxu1 %v897_v17  ;;  %v838_v25 = vpack.c.bf16 %v31_v23, %v30_v20  ;;  %p874_p0 = scmp.ne.s32.totalorder %s605_s21, %s873_s1  ;;  %p879_p2 = scmp.lt.s32.totalorder %s873_s1, %s873_s1 }
 0x490   :  { %p880_p3 = por %p879_p2, %p878_p1 }
 0x491   :  { %797 = vmatpush3.bf16.msra.mxu1 %v992_v26  ;;  %v173_v26 = vadd.f32 %v1003_v27, %v1057_v52 }
 0x492   :  { %p881_p4 = pnand %p880_p3, %p874_p0 }
 0x557   :  { %v408_v14 = vpop.f32.mrb[8].mxu1 }
 0x558   :  { %v414_v15 = vadd.f32 %v408_v14, %v168_v13  ;;  %v776_v16 = vpop.f32.mrb[9].mxu1 }
 0x559   :  { %v411_v18 = vpop.f32.mrb[10].mxu1 }
 0x55a   :  { %863 = vtanh.f32 %v414_v15  ;;  %v777_v19 = vpop.f32.mrb[11].mxu1 }
 0x564   :  { %v864_v21 = vpop.eup %863 }
 0x565   :  { %v416_v22 = vpack.c.bf16 %v864_v21, %v864_v21 }
 0x567   :  { %787 = vmatmul.mubr.msk.bf16.vlgmr.msra.gmra.mrb[16].mxu0 %vm51_vm0, %v416_v22 }
 0x568   :  { %818 = vmatprep.mubr.msk.f32.mxu0 %vm898_vm1, %v897_v17  ;;  %839 = vmatpush3.bf16.msra.mxu0 %v838_v25 }
 0x569   :  { %840 = vmatprep.subr.bf16.mxu0 %v899_v24 }
 0x56c   :  { %842 = vmatpush3.bf16.msra.mxu0 %v841_v36 }
 0x56d   :  { %843 = vmatprep.subr.bf16.mxu0 %v899_v24 }
 0x570   :  { %845 = vmatpush3.bf16.msra.mxu0 %v844_v39 }
 0x571   :  { %846 = vmatprep.subr.bf16.mxu0 %v899_v24 }
 0x574   :  { %848 = vmatpush3.bf16.msra.mxu0 %v847_v42 }
 0x63a   :  { %v454_v28 = vpop.f32.mrb[16].mxu0 }
 0x63b   :  { %v460_v29 = vadd.f32 %v454_v28, %v173_v26  ;;  %v788_v30 = vpop.f32.mrb[17].mxu0 }
 0x63c   :  { %v457_v17 = vpop.f32.mrb[18].mxu0 }
 0x63d   :  { %865 = vtanh.f32 %v460_v29  ;;  %v789_v31 = vpop.f32.mrb[19].mxu0 }
 0x647   :  { %v866_v32 = vpop.eup %865 }
 0x648   :  { %v462_v33 = vpack.c.bf16 %v866_v32, %v866_v32 }
 0x64a   :  { %799 = vmatmul.mubr.msk.bf16.vlgmr.msra.gmra.mrb[12].mxu1 %vm51_vm0, %v462_v33 }
 0x71d   :  { %v500_v44 = vpop.f32.mrb[12].mxu1 }
 0x71e   :  { %v506_v45 = vadd.f32 %v500_v44, %v178_v43  ;;  %v800_v46 = vpop.f32.mrb[13].mxu1 }
 0x71f   :  { %v503_v47 = vpop.f32.mrb[14].mxu1 }
 0x720   :  { %867 = vtanh.f32 %v506_v45  ;;  %v801_v48 = vpop.f32.mrb[15].mxu1 }
 0x72a   :  { %v868_v49 = vpop.eup %867 }
 0x72b   :  { %819 = vmatmul.mubr.msk.f32.vlgmr.msra.gmra.mrb[20].mxu0 %vm51_vm0, %v868_v49 }
 0x7fe   :  { %v581_v52 = vpop.f32.mrb[20].mxu0 }
 0x7ff   :  { %v582_v53 = vadd.f32 %v628_v50, %v581_v52  ;;  %v820_v54 = vpop.f32.mrb[21].mxu0 }
 0x801   :  { %v586_v55 = vsel %vm585_vm2, %v582_v53, -inf }
 0x802   :  { %587 = vmax.xlane.f32.xlu0 %v586_v55 }
 0x88f   :  { %v588_v27 = vpop.xlane.xlu0 %587 }
 0x890   :  { %v589_v51 = vsub.f32 %v582_v53, %v588_v27 }
 0x892   :  { %v590_v56 = vmul.f32 1.442695, %v589_v51 }
 0x894   :  { %869 = vpow2.f32 %v590_v56 }
 0x89e   :  { %v870_v57 = vpop.eup %869 }
 0x89f   :  { %v592_v58 = vsel %vm585_vm2, %v870_v57, 0.0 }
 0x8a0   :  { %593 = vadd.xlane.f32.xlu0 %v592_v58 }
 0x92d   :  { %v594_v59 = vpop.xlane.xlu0 %593 }
 0x92e   :  { %871 = vrcp.f32 %v594_v59 }
 0x938   :  { %v872_v60 = vpop.eup %871 }
 0x939   :  { %v596_v61 = vmul.f32 %v872_v60, %v870_v57 }
 0x93b   :  { %597 = vst.msk [vmem:[#allocation2] sm:$0x3] %vm585_vm2, %v596_v61 }
 0x93c   :  { %884 = shalt.err (!%p881_p4)
}
 0x93d   :  { %s885_s24 = scalar_lea.hbm %s1147_s2, 32 }
 0x93e   :  { %p886_p5 = scmp.ne.s32.totalorder %s1147_s2, %s885_s24  ;;  %p889_p6 = scmp.lt.u32.totalorder %s885_s24, %s1147_s2 }
 0x940   :  { %p891_p7 = pnand %p889_p6, %p886_p5 }
 0x942   :  { %894 = shalt.err (!%p891_p7)
}
 0x943   :  { %607 = dma.vmem_to_hbm [thread:$0]  %s605_s21, 32, %s1147_s2, [#allocation3]  }
 0x944   :  { %895 = dma.done.wait [#allocation3], 32  }
 0x945   :  { %896 = vsyncadd [#allocation3], 4294967264 }
 0x946   :  { %611 = vsyncpa [#allocation3], 1 }

</bundles_post_ra>
